<compile_context>
chip_gen: v7x
topology: tpu7x:2x2x1
jax: 0.10.0
libtpu: 0.0.40
codegen_flags: <defaults>
</compile_context>

<pallas_src>
import jax
import jax.numpy as jnp
from jax.experimental import pallas as pl
from jax.experimental.pallas import tpu as pltpu


# ----------------------------- tiling helpers -------------------------------

def _pick_lane_tile(L, target, min_blocks=1):
    """Largest multiple of 128 that divides L and is <= target, yielding at
    least `min_blocks` blocks when possible; full dim if L isn't 128-aligned."""
    if L % 128 != 0:
        return L
    cap = min(target, L)
    if min_blocks > 1:
        cap = min(cap, max(128, L // min_blocks))
    t = max(128, cap - cap % 128)
    while L % t:
        t -= 128
    return t


def _pick_sublane_tile(R, target):
    """Largest multiple of 8 that divides R and is <= target; full dim if R
    isn't 8-aligned (a full-dim block is always legal)."""
    if R % 8 != 0:
        return R
    t = max(8, min(target, R) - (min(target, R) % 8))
    while R % t:
        t -= 8
    return t


def _vmem_limit(block_bytes):
    # Double-buffered blocks + headroom; floor at the smallest default scoped
    # limit (16 MiB) and stay under v7x's 64 MiB/TC physical VMEM.
    return int(min(60 * 1024 * 1024, max(16 * 1024 * 1024, 4 * block_bytes)))


# -------------------- fused 1x1-conv backbone + VS affine -------------------

def _conv1x1_affine_kernel(x_ref, w_ref, b_ref, o_ref):
    # x_ref: (C_in, t_hw)   f32 activation tile of one image (lane-dense H*W).
    # w_ref: (K_cls, C_in)  f32 weights with the VS scale already folded in.
    # b_ref: (K_cls, 1)     f32 fused bias/offset, broadcast along lanes.
    # o_ref: (K_cls, t_hw)  f32 output tile.
    x = x_ref[...]
    w = w_ref[...]
    c_in = x.shape[0]
    # Tiny contraction (C_in ~ 3): unrolled exact-f32 VPU FMAs.  The kernel is
    # HBM-bound, so the MXU would be idle regardless; this also removes the K
    # grid axis / accumulator / pl.when machinery of the previous version.
    acc = w[:, 0:1] * x[0:1, :] + b_ref[...]
    for c in range(1, c_in):
        acc = acc + w[:, c:c + 1] * x[c:c + 1, :]
    o_ref[...] = acc


def conv1x1_affine(x3, w, shift, *, lane_tile_target=4096):
    """out[n] = w @ x3[n] + shift (per image).

    x3: (N, C_in, L) f32, w: (K_cls, C_in) f32, shift: (K_cls,) f32
    -> (N, K_cls, L) f32.  No padding, no transposes.
    """
    N, C_in, L = x3.shape
    K_cls = w.shape[0]
    assert w.shape == (K_cls, C_in)

    # Make sure both TensorCores (v7x) get at least one block.
    min_lane_blocks = 1 if N >= 2 else 2
    t_hw = _pick_lane_tile(L, lane_tile_target, min_lane_blocks)

    x3 = x3.astype(jnp.float32)
    w2 = w.astype(jnp.float32)
    b2 = shift.reshape(K_cls, 1).astype(jnp.float32)

    block_bytes = 4 * (C_in * t_hw + K_cls * C_in + K_cls + K_cls * t_hw)

    return pl.pallas_call(
        _conv1x1_affine_kernel,
        out_shape=jax.ShapeDtypeStruct((N, K_cls, L), jnp.float32),
        grid=(N, L // t_hw),
        in_specs=[
            # Batch dim squeezed; C_in / K_cls full-dim blocks (legal even
            # though they are not 8-multiples), H*W tiled in 128-multiples.
            pl.BlockSpec((None, C_in, t_hw), lambda n, j: (n, 0, j)),
            pl.BlockSpec((K_cls, C_in), lambda n, j: (0, 0)),
            pl.BlockSpec((K_cls, 1), lambda n, j: (0, 0)),
        ],
        out_specs=pl.BlockSpec((None, K_cls, t_hw), lambda n, j: (n, 0, j)),
        compiler_params=pltpu.CompilerParams(
            dimension_semantics=("parallel", "parallel"),
            vmem_limit_bytes=_vmem_limit(block_bytes)),
    )(x3, w2, b2)


# ----------------------- standalone VS affine kernel ------------------------

def _vector_scale_kernel(l_ref, s_ref, b_ref, o_ref):
    # (tr, t_hw) * (tr, 1) + (tr, 1): per-row scale/offset broadcast over lanes.
    o_ref[...] = l_ref[...] * s_ref[...] + b_ref[...]


def vector_scale(logits, vp, vo, *, row_tile_target=256, lane_tile_target=1024):
    """vp * logits + vo with per-channel (1,C,1,1) params, logits in NCHW.

    NCHW-native: logits viewed as (N*C, H*W) (free reshape, H*W lane-dense);
    vp/vo expanded to per-row (N*C, 1) columns.  No transposes, no channel
    padding, no output slice.
    """
    N, C, H, W = logits.shape
    R, L = N * C, H * W
    l2 = logits.reshape(R, L).astype(jnp.float32)
    s = jnp.tile(vp.reshape(C, 1).astype(jnp.float32), (N, 1))   # (R, 1)
    b = jnp.tile(vo.reshape(C, 1).astype(jnp.float32), (N, 1))   # (R, 1)

    tr = _pick_sublane_tile(R, row_tile_target)
    min_lane_blocks = 1 if (R // tr) >= 2 else 2                  # feed 2 TCs
    t_hw = _pick_lane_tile(L, lane_tile_target, min_lane_blocks)

    block_bytes = 4 * (2 * tr * t_hw + 2 * tr)

    out = pl.pallas_call(
        _vector_scale_kernel,
        out_shape=jax.ShapeDtypeStruct((R, L), jnp.float32),
        grid=(R // tr, L // t_hw),
        in_specs=[pl.BlockSpec((tr, t_hw), lambda i, j: (i, j)),
                  pl.BlockSpec((tr, 1), lambda i, j: (i, 0)),
                  pl.BlockSpec((tr, 1), lambda i, j: (i, 0))],
        out_specs=pl.BlockSpec((tr, t_hw), lambda i, j: (i, j)),
        compiler_params=pltpu.CompilerParams(
            dimension_semantics=("parallel", "parallel"),
            vmem_limit_bytes=_vmem_limit(block_bytes)),
    )(l2, s, b)
    return out.reshape(N, C, H, W)


# ------------------------------- VS forward ---------------------------------

def vs_forward(x, params):
    """VS.forward: logits = backbone(x); return vp * logits + vo.

    The backbone stand-in (1x1 conv) and the VS affine are fused into a single
    NCHW-native pallas_call:  vp*(W@x + b) + vo == (vp*W)@x + (vp*b + vo).
    """
    N, C_in, H, W = x.shape
    w = params['backbone_w']                         # (num_classes, C_in)
    num_classes = w.shape[0]
    vp = params['vector_parameters'].reshape(num_classes)
    vo = params['vector_offset'].reshape(num_classes)
    ws = w * vp[:, None]                              # scale folded into weights (f32)
    shift = params['backbone_b'] * vp + vo            # fused bias + offset

    x3 = x.reshape(N, C_in, H * W)                    # free reshape, stays NCHW
    out = conv1x1_affine(x3, ws, shift)               # (N, num_classes, H*W)
    return out.reshape(N, num_classes, H, W)


def vs_reference(x, params):
    """Plain-JAX reference of the same forward (f32)."""
    logits = (jnp.einsum('nchw,kc->nkhw', x, params['backbone_w'])
              + params['backbone_b'][None, :, None, None])
    return params['vector_parameters'] * logits + params['vector_offset']


# ----------------------- deterministic parameter init -----------------------

def init_params(key, num_classes, img_channels):
    kb, kbias, kvp, kvo = jax.random.split(key, 4)
    return {
        # TODO(synk): backbone_model is external/unspecified; 1x1-conv stand-in.
        'backbone_w': 0.1 * jax.random.normal(
            kb, (num_classes, img_channels), jnp.float32),
        'backbone_b': 0.05 * jax.random.normal(
            kbias, (num_classes,), jnp.float32),
        # VS learnable params. weights_init() sets fill(1)/fill(0); we use
        # nontrivial (trained-like) values so the fused affine is exercised.
        'vector_parameters': 1.0 + 0.1 * jax.random.normal(
            kvp, (1, num_classes, 1, 1), jnp.float32),
        'vector_offset': 0.05 * jax.random.normal(
            kvo, (1, num_classes, 1, 1), jnp.float32),
    }


# ----------------------------------- main ------------------------------------

if __name__ == "__main__":
    key = jax.random.PRNGKey(0)
    k_x, k_p = jax.random.split(key)

    N, IMG_C, NUM_CLASSES, H, W = 2, 3, 10, 16, 16
    x = jax.random.normal(k_x, (N, IMG_C, H, W), jnp.float32)
    params = init_params(k_p, num_classes=NUM_CLASSES, img_channels=IMG_C)

    # Fused path: backbone 1x1 conv + VS affine in one pallas_call.
    out = jax.jit(vs_forward)(x, params)
    out = jax.block_until_ready(out)
    assert out.shape == (N, NUM_CLASSES, H, W), out.shape
    assert bool(jnp.all(jnp.isfinite(out)))

    ref = vs_reference(x, params)
    # Fully-f32 path -> tight tolerance vs the f32 reference.
    assert bool(jnp.allclose(out, ref, atol=1e-4, rtol=1e-4)), \
        float(jnp.max(jnp.abs(out - ref)))

    # Standalone VS affine kernel (the module's literal op, unfused path).
    logits_ref = (jnp.einsum('nchw,kc->nkhw', x, params['backbone_w'])
                  + params['backbone_b'][None, :, None, None])
    vs_out = jax.jit(vector_scale)(
        logits_ref, params['vector_parameters'], params['vector_offset'])
    vs_out = jax.block_until_ready(vs_out)
    vs_ref = (params['vector_parameters'] * logits_ref
              + params['vector_offset'])
    assert bool(jnp.allclose(vs_out, vs_ref, atol=1e-5, rtol=1e-5))

    print("KERNEL_OK")
</pallas_src>

<mosaic_0001>
module attributes {stable_mosaic.version = 11 : i64} {
  func.func @_conv1x1_affine_kernel(%arg0: i32, %arg1: i32, %arg2: memref<1x3x256xf32, #tpu.memory_space<vmem>>, %arg3: memref<10x3xf32, #tpu.memory_space<vmem>>, %arg4: memref<10x1xf32, #tpu.memory_space<vmem>>, %arg5: memref<1x10x256xf32, #tpu.memory_space<vmem>>) attributes {dimension_semantics = [#tpu.dimension_semantics<parallel>, #tpu.dimension_semantics<parallel>], iteration_bounds = array<i64: 2, 1>, scalar_prefetch = 0 : i64, scratch_operands = 0 : i64, tpu.core_type = #tpu.core_type<tc>, window_params = [{transform_indices = @transform_0, window_bounds = array<i64: 1, 3, 256>}, {pipeline_mode = #tpu.pipeline_mode<synchronous>, transform_indices = @transform_1, window_bounds = array<i64: 10, 3>}, {pipeline_mode = #tpu.pipeline_mode<synchronous>, transform_indices = @transform_2, window_bounds = array<i64: 10, 1>}, {transform_indices = @transform_3, window_bounds = array<i64: 1, 10, 256>}]} {
    %c0 = arith.constant 0 : index
    %c0_0 = arith.constant 0 : index
    %c0_1 = arith.constant 0 : index
    %0 = vector.load %arg2[%c0, %c0_0, %c0_1] : memref<1x3x256xf32, #tpu.memory_space<vmem>>, vector<1x3x256xf32>
    %1 = vector.shape_cast %0 : vector<1x3x256xf32> to vector<3x256xf32>
    %c0_2 = arith.constant 0 : index
    %c0_3 = arith.constant 0 : index
    %2 = vector.load %arg3[%c0_2, %c0_3] : memref<10x3xf32, #tpu.memory_space<vmem>>, vector<10x3xf32>
    %3 = vector.extract_strided_slice %2 {offsets = [0, 0], sizes = [10, 1], strides = [1, 1]} : vector<10x3xf32> to vector<10x1xf32>
    %4 = vector.extract_strided_slice %1 {offsets = [0, 0], sizes = [1, 256], strides = [1, 1]} : vector<3x256xf32> to vector<1x256xf32>
    %5 = vector.broadcast %3 : vector<10x1xf32> to vector<10x256xf32>
    %6 = vector.broadcast %4 : vector<1x256xf32> to vector<10x256xf32>
    %7 = arith.mulf %5, %6 : vector<10x256xf32>
    %c0_4 = arith.constant 0 : index
    %c0_5 = arith.constant 0 : index
    %8 = vector.load %arg4[%c0_4, %c0_5] : memref<10x1xf32, #tpu.memory_space<vmem>>, vector<10x1xf32>
    %9 = vector.broadcast %8 : vector<10x1xf32> to vector<10x256xf32>
    %10 = arith.addf %7, %9 : vector<10x256xf32>
    %11 = vector.extract_strided_slice %2 {offsets = [0, 1], sizes = [10, 1], strides = [1, 1]} : vector<10x3xf32> to vector<10x1xf32>
    %12 = vector.extract_strided_slice %1 {offsets = [1, 0], sizes = [1, 256], strides = [1, 1]} : vector<3x256xf32> to vector<1x256xf32>
    %13 = vector.broadcast %11 : vector<10x1xf32> to vector<10x256xf32>
    %14 = vector.broadcast %12 : vector<1x256xf32> to vector<10x256xf32>
    %15 = arith.mulf %13, %14 : vector<10x256xf32>
    %16 = arith.addf %10, %15 : vector<10x256xf32>
    %17 = vector.extract_strided_slice %2 {offsets = [0, 2], sizes = [10, 1], strides = [1, 1]} : vector<10x3xf32> to vector<10x1xf32>
    %18 = vector.extract_strided_slice %1 {offsets = [2, 0], sizes = [1, 256], strides = [1, 1]} : vector<3x256xf32> to vector<1x256xf32>
    %19 = vector.broadcast %17 : vector<10x1xf32> to vector<10x256xf32>
    %20 = vector.broadcast %18 : vector<1x256xf32> to vector<10x256xf32>
    %21 = arith.mulf %19, %20 : vector<10x256xf32>
    %22 = arith.addf %16, %21 : vector<10x256xf32>
    %c0_6 = arith.constant 0 : index
    %c0_7 = arith.constant 0 : index
    %c0_8 = arith.constant 0 : index
    %23 = vector.load %arg5[%c0_6, %c0_7, %c0_8] : memref<1x10x256xf32, #tpu.memory_space<vmem>>, vector<1x10x256xf32>
    %24 = vector.shape_cast %23 : vector<1x10x256xf32> to vector<10x256xf32>
    %25 = vector.shape_cast %22 : vector<10x256xf32> to vector<1x10x256xf32>
    tpu.vector_store %arg5[%c0_6, %c0_7, %c0_8], %25 {strides = array<i32>} : memref<1x10x256xf32, #tpu.memory_space<vmem>>, vector<1x10x256xf32>,
    return
  }
  func.func @transform_0(%arg0: i32, %arg1: i32) -> (i32, i32, i32) {
    %c0_i32 = arith.constant 0 : i32
    %c0_i32_0 = arith.constant 0 : i32
    return %arg0, %c0_i32, %arg1 : i32, i32, i32
  }
  func.func @transform_1(%arg0: i32, %arg1: i32) -> (i32, i32) {
    %c0_i32 = arith.constant 0 : i32
    %c0_i32_0 = arith.constant 0 : i32
    %c0_i32_1 = arith.constant 0 : i32
    return %c0_i32, %c0_i32_0 : i32, i32
  }
  func.func @transform_2(%arg0: i32, %arg1: i32) -> (i32, i32) {
    %c0_i32 = arith.constant 0 : i32
    %c0_i32_0 = arith.constant 0 : i32
    %c0_i32_1 = arith.constant 0 : i32
    return %c0_i32, %c0_i32_0 : i32, i32
  }
  func.func @transform_3(%arg0: i32, %arg1: i32) -> (i32, i32, i32) {
    %c0_i32 = arith.constant 0 : i32
    %c0_i32_0 = arith.constant 0 : i32
    return %arg0, %c0_i32, %arg1 : i32, i32, i32
  }
}

</mosaic_0001>

<bundles_post_ra>
// kernel: vs_forward.1
= control target key start
LH: loop header
LB: loop body
LE: loop exit
PB: predicated region body
PF: predicated region fallthrough
CT: control target
= control target key end

     0   :  { %s514_s12 = smov 0   ;;  %s516_s13 = smov 0   ;;  %s567_s0 = inlined_call_operand.vmem [shape: f32[2,3,256], index: 0, kind: input, shape index: {}]   ;;  %s568_s1 = inlined_call_operand.vmem [shape: f32[10,3], index: 1, kind: input, shape index: {}]   ;;  %s569_s2 = inlined_call_operand.vmem [shape: f32[10,1], index: 2, kind: input, shape index: {}]   ;;  %s570_s3 = inlined_call_operand.vmem [shape: f32[2,10,256], index: 3, kind: output, shape index: {}]  }
   0x1   :  { %s518_s14 = smov 0  }
   0x2 LB: > { %s25_s15 = sadd.s32 1, %s485_s13  ;;  %p425_p0 = scmp.ge.s32.totalorder %s489_s14, 1  ;;  %s489_s14 = sphi %s518_s14, %s13_s14   ;;  %s485_s13 = sphi %s516_s13, %s572_s13   ;;  %s481_s12 = sphi %s514_s12, %s571_s12  }
   0x3   : > { %p27_p1 = scmp.ge.s32.totalorder %s25_s15, 2  ;;  %p158_p2 = scmp.lt.s32.totalorder %s489_s14, 3 }
   0x5   : > { %s574_s15 = smov (%p27_p1, %s25_s15), 0  ;;  %p159_p3 = pnand %p425_p0, %p158_p2 }
   0x6   : > { %v246_v0 = vld [vmem:[%s569_s2] sm:$0xff] (!%p159_p3)  ;;  %v491_v2 = vmov (!%p159_p3), 0   ;;  %v247_v3 = vld [vmem:[%s569_s2 + $0x8] sm:$0x3] (!%p159_p3)  ;;  %v492_v5 = vmov (!%p159_p3), 1   ;;  %v493_v6 = vmov (!%p159_p3), 2   ;;  %v224_v7 = vlaneseq (!%p159_p3) }
   0x7   : > { %162 = sbr.rel (%p159_p3) target bundleno = 156 (0x9c), region = 32  ;;  %v211_v1 = vld [vmem:[%s568_s1] sm:$0xff] (!%p159_p3)  ;;  %462 = vset.pattern.permute.xlu1 (!%p159_p3), %v491_v2  ;;  %461 = vset.pattern.permute.xlu0 (!%p159_p3), %v491_v2  ;;  %v212_v4 = vld [vmem:[%s568_s1 + $0x8] sm:$0x3] (!%p159_p3)  ;;  %p191_p4 = scmp.lt.s32.totalorder (!%p159_p3), %s481_s12, 1 }
   0x8   : > { %250 = vperm.xlu1 (!%p159_p3), %462, %v246_v0   ;;  %215 = vperm.xlu0 (!%p159_p3), %461, %v211_v1   ;;  %v225_v8 = vshrl.u32 (!%p159_p3), %v224_v7, 7 }
   0xa   : > { %v226_v9 = vsub.s32 (!%p159_p3), 0, %v225_v8  ;;  %v230_v10 = vsub.s32 (!%p159_p3), 4, %v225_v8  ;;  %v272_v12 = vsub.s32 (!%p159_p3), 1, %v225_v8  ;;  %v276_v13 = vsub.s32 (!%p159_p3), 5, %v225_v8 }
   0xb   : > { %v306_v20 = vsub.s32 (!%p159_p3), 2, %v225_v8  ;;  %v310_v21 = vsub.s32 (!%p159_p3), 6, %v225_v8 }
   0xc   : > { %255 = vperm.xlu1 (!%p159_p3), %462, %v247_v3   ;;  %220 = vperm.xlu0 (!%p159_p3), %461, %v212_v4  }
   0xe   : > { %s576_s12 = smov (!%p191_p4, %s481_s12), 1 }
   0xf   : > { %s432_s24 = sshll.u32 %s576_s12, 3  ;;  %s433_s28 = sshll.u32 %s576_s12, 5 }
  0x10   : > { %464 = vset.pattern.permute.xlu1 %v492_v5  ;;  %463 = vset.pattern.permute.xlu0 %v492_v5  ;;  %s198_s27 = scalar_lea.vmem %s567_s0, %s432_s24  ;;  %s208_s4 = scalar_lea.vmem %s570_s3, %s433_s28 }
  0x11   : > { %267 = vperm.xlu1 %464, %v212_v4   ;;  %263 = vperm.xlu0 %463, %v211_v1   ;;  %v210_v11 = vld [vmem:[%s198_s27] sm:$0x77] }
  0x12   : > { %v227_v16 = vrot.slane %v210_v11, %v226_v9  ;;  %v231_v17 = vrot.slane %v210_v11, %v230_v10  ;;  %v273_v18 = vrot.slane %v210_v11, %v272_v12  ;;  %v277_v19 = vrot.slane %v210_v11, %v276_v13 }
  0x13   : > { %v307_v28 = vrot.slane %v210_v11, %v306_v20  ;;  %v311_v29 = vrot.slane %v210_v11, %v310_v21 }
  0x14   : > { %v237_v22 = vrot.slane %v227_v16, %v226_v9  ;;  %v241_v23 = vrot.slane %v231_v17, %v226_v9  ;;  %v283_v26 = vrot.slane %v273_v18, %v272_v12  ;;  %v287_v27 = vrot.slane %v277_v19, %v272_v12 }
  0x15   : > { %465 = vset.pattern.permute.xlu1 %v493_v6  ;;  %466 = vset.pattern.permute.xlu0 %v493_v6  ;;  %v317_v40 = vrot.slane %v307_v28, %v306_v20  ;;  %v321_v41 = vrot.slane %v311_v29, %v306_v20 }
  0x16   : > { %297 = vperm.xlu1 %465, %v211_v1   ;;  %301 = vperm.xlu0 %466, %v212_v4  }
  0x87   : > { %v251_v14 = vpop.permute.xlu1 %250  ;;  %v216_v15 = vpop.permute.xlu0 %215 }
  0x88   : > { %v242_v30 = vmul.f32 %v237_v22, %v216_v15  ;;  %v243_v31 = vmul.f32 %v241_v23, %v216_v15 }
  0x8a   : > { %v258_v42 = vadd.f32 %v251_v14, %v242_v30  ;;  %v259_v43 = vadd.f32 %v251_v14, %v243_v31 }
  0x8b   : > { %v256_v24 = vpop.permute.xlu1 %255  ;;  %v221_v25 = vpop.permute.xlu0 %220 }
  0x8c   : > { %v244_v32 = vmul.f32 %v237_v22, %v221_v25  ;;  %v245_v33 = vmul.f32 %v241_v23, %v221_v25 }
  0x8e   : > { %v260_v44 = vadd.f32 %v256_v24, %v244_v32  ;;  %v261_v45 = vadd.f32 %v256_v24, %v245_v33 }
  0x90   : > { %v268_v34 = vpop.permute.xlu1 %267  ;;  %v264_v35 = vpop.permute.xlu0 %263 }
  0x91   : > { %v290_v36 = vmul.f32 %v283_v26, %v268_v34  ;;  %v291_v37 = vmul.f32 %v287_v27, %v268_v34  ;;  %v288_v38 = vmul.f32 %v283_v26, %v264_v35  ;;  %v289_v39 = vmul.f32 %v287_v27, %v264_v35 }
  0x93   : > { %v294_v46 = vadd.f32 %v290_v36, %v260_v44  ;;  %v295_v47 = vadd.f32 %v291_v37, %v261_v45  ;;  %v292_v48 = vadd.f32 %v288_v38, %v258_v42  ;;  %v293_v49 = vadd.f32 %v289_v39, %v259_v43 }
  0x95   : > { %v298_v50 = vpop.permute.xlu1 %297  ;;  %v302_v51 = vpop.permute.xlu0 %301 }
  0x96   : > { %v322_v52 = vmul.f32 %v317_v40, %v298_v50  ;;  %v323_v53 = vmul.f32 %v321_v41, %v298_v50  ;;  %v324_v54 = vmul.f32 %v317_v40, %v302_v51  ;;  %v325_v55 = vmul.f32 %v321_v41, %v302_v51 }
  0x98   : > { %v326_v56 = vadd.f32 %v322_v52, %v292_v48  ;;  %v327_v57 = vadd.f32 %v323_v53, %v293_v49  ;;  %v328_v58 = vadd.f32 %v324_v54, %v294_v46  ;;  %v329_v59 = vadd.f32 %v325_v55, %v295_v47 }
  0x9a   : > { %330 = vst [vmem:[%s208_s4] sm:$0xff] %v326_v56  ;;  %331 = vst [vmem:[%s208_s4 + $0x8] sm:$0xff] %v327_v57 }
  0x9b   : > { %332 = vst [vmem:[%s208_s4 + $0x10] sm:$0x3] %v328_v58  ;;  %333 = vst [vmem:[%s208_s4 + $0x18] sm:$0x3] %v329_v59 }
  0x9c PF: > { %s13_s14 = sadd.s32 1, %s489_s14   ;;  %s571_s12 = smov %s485_s13 }
  0x9d   : > { %p10_p5 = scmp.ge.s32.totalorder %s13_s14, 4   ;;  %s572_s13 = smov %s574_s15 }
  0x9f   :  { %12 = sbr.rel (!%p10_p5) target bundleno = 2 (0x2), region = 62 }

</bundles_post_ra>
